<compile_context>
chip_gen: v6e
topology: v6e:2x2x1
jax: 0.10.0
libtpu: 0.0.40
codegen_flags: <defaults>
</compile_context>

<pallas_src>
import functools
import math

import jax
import jax.numpy as jnp
from jax.experimental import pallas as pl
from jax.experimental.pallas import tpu as pltpu

LANE = 128  # every feature dim is zero-padded to a multiple of this


def _round_up(x, m):
    return ((x + m - 1) // m) * m


def _sublane(dtype):
    # bf16 packs 16 rows per vreg; f32 packs 8.
    return 16 if jnp.dtype(dtype) == jnp.dtype(jnp.bfloat16) else 8


def _pad2d(a, rows, cols):
    r, c = a.shape
    if r == rows and c == cols:
        return a
    return jnp.pad(a, ((0, rows - r), (0, cols - c)))


def _pad_feat_tiled(d):
    """Tiled-fallback feature padding: pad UP to the tile (<=512 -> single
    K/N step) instead of shrinking tk/tn down to 128."""
    p = _round_up(d, LANE)
    return p if p <= 512 else _round_up(p, 512)


# ----------------------------------------------------------------------------
# Generation-aware VMEM budget (v5e/v6e: 128 MiB physical, v7x: 64 MiB)
# ----------------------------------------------------------------------------
def _vmem_capacity_bytes():
    try:
        cap = getattr(pltpu.get_tpu_info(), "vmem_capacity_bytes", None)
        if cap:
            return int(cap)
    except Exception:
        pass
    return 64 * 1024 * 1024  # conservative default (v7x per-TC physical VMEM)


_VMEM_CAP = _vmem_capacity_bytes()
_FUSED_VMEM_BUDGET = int(0.40 * _VMEM_CAP)                  # fused-path eligibility
_VMEM_LIMIT_BYTES = min(int(0.70 * _VMEM_CAP), 96 << 20)    # scoped-VMEM limit to request


# ----------------------------------------------------------------------------
# Fused whole-MLP kernel: all layers in one pallas_call, activations in VMEM
# ----------------------------------------------------------------------------
def _fused_mlp_kernel(*refs, n_layers):
    """refs = (x, w0, b0, ..., w_{L-1}, b_{L-1}, out).

    x:   (TB, D0p)        activation tile (already in compute dtype)
    w_l: (D_lp, D_{l+1}p) padded weight, pre-cast to compute dtype, VMEM-resident
    b_l: (1,  D_{l+1}p)   padded f32 bias row
    out: (TB, D_Lp)       output tile
    """
    x_ref = refs[0]
    o_ref = refs[-1]

    h = x_ref[...]
    for l in range(n_layers):                      # static unroll over layers
        w = refs[1 + 2 * l][...]
        b = refs[2 + 2 * l][...]
        # MXU matmul in the weight dtype, f32 accumulation; f32 epilogue.
        h = jnp.dot(h.astype(w.dtype), w, preferred_element_type=jnp.float32)
        h = jnp.maximum(h + b, 0.0)
    o_ref[...] = h.astype(o_ref.dtype)


def _fused_apply(xp, flat_params, pdims, batch_tile, out_dtype,
                 single_buffer_weights):
    n_layers = len(flat_params) // 2
    Bp = xp.shape[0]
    grid = (Bp // batch_tile,)

    # Constant index_map: weights/biases never change blocks across the batch
    # grid.  Buffered(1) reclaims the second (useless) pipeline buffer.
    resident_kwargs = (
        dict(pipeline_mode=pl.Buffered(buffer_count=1))
        if single_buffer_weights else {})

    in_specs = [pl.BlockSpec((batch_tile, pdims[0]), lambda i: (i, 0))]
    for l in range(n_layers):
        in_specs.append(pl.BlockSpec((pdims[l], pdims[l + 1]),
                                     lambda i: (0, 0), **resident_kwargs))
        in_specs.append(pl.BlockSpec((1, pdims[l + 1]),
                                     lambda i: (0, 0), **resident_kwargs))
    out_spec = pl.BlockSpec((batch_tile, pdims[-1]), lambda i: (i, 0))

    flops = 2 * Bp * sum(pdims[l] * pdims[l + 1] for l in range(n_layers))
    bytes_accessed = int(
        xp.size * xp.dtype.itemsize
        + sum(p.size * p.dtype.itemsize for p in flat_params)
        + Bp * pdims[-1] * jnp.dtype(out_dtype).itemsize)

    return pl.pallas_call(
        functools.partial(_fused_mlp_kernel, n_layers=n_layers),
        out_shape=jax.ShapeDtypeStruct((Bp, pdims[-1]), out_dtype),
        grid=grid,
        in_specs=in_specs,
        out_specs=out_spec,
        compiler_params=pltpu.CompilerParams(
            dimension_semantics=("parallel",),
            vmem_limit_bytes=_VMEM_LIMIT_BYTES),
        cost_estimate=pl.CostEstimate(flops=int(flops), transcendentals=0,
                                      bytes_accessed=bytes_accessed),
    )(xp, *flat_params)


# ----------------------------------------------------------------------------
# Per-layer (M, N, K)-tiled Linear+ReLU fallback (weights too big for VMEM)
# ----------------------------------------------------------------------------
def _tiled_linear_relu_kernel(x_ref, w_ref, b_ref, o_ref, acc_ref):
    @pl.when(pl.program_id(2) == 0)
    def _():
        acc_ref[...] = jnp.zeros_like(acc_ref)

    # Inputs are already in compute dtype (pre-cast in HBM) -> no per-step cast.
    acc_ref[...] += jnp.dot(x_ref[...], w_ref[...],
                            preferred_element_type=jnp.float32)

    @pl.when(pl.program_id(2) == pl.num_programs(2) - 1)
    def _():
        o_ref[...] = jnp.maximum(acc_ref[...] + b_ref[...],
                                 0.0).astype(o_ref.dtype)


def _linear_relu_tiled_padded(xp, wp, bp, tm, out_dtype):
    """xp: (Bp, Kp) padded activation (compute dtype); wp: (Kp, Np) padded
    weight (compute dtype); bp: (1, Np) f32 bias.  Returns padded (Bp, Np)."""
    Bp, Kp = xp.shape
    Np = wp.shape[1]
    tk = min(512, Kp)
    tn = min(512, Np)
    grid = (Bp // tm, Np // tn, Kp // tk)

    flops = 2 * Bp * Kp * Np
    bytes_accessed = int(xp.size * xp.dtype.itemsize
                         + wp.size * wp.dtype.itemsize
                         + bp.size * bp.dtype.itemsize
                         + Bp * Np * jnp.dtype(out_dtype).itemsize)

    return pl.pallas_call(
        _tiled_linear_relu_kernel,
        out_shape=jax.ShapeDtypeStruct((Bp, Np), out_dtype),
        grid=grid,
        in_specs=[
            pl.BlockSpec((tm, tk), lambda i, j, k: (i, k)),
            pl.BlockSpec((tk, tn), lambda i, j, k: (k, j)),
            pl.BlockSpec((1, tn), lambda i, j, k: (0, j)),
        ],
        out_specs=pl.BlockSpec((tm, tn), lambda i, j, k: (i, j)),
        scratch_shapes=[pltpu.VMEM((tm, tn), jnp.float32)],
        compiler_params=pltpu.CompilerParams(
            dimension_semantics=("parallel", "parallel", "arbitrary"),
            vmem_limit_bytes=_VMEM_LIMIT_BYTES),
        cost_estimate=pl.CostEstimate(flops=int(flops), transcendentals=0,
                                      bytes_accessed=bytes_accessed),
    )(xp, wp, bp)


# ----------------------------------------------------------------------------
# Parameter preparation (hoisted out of the forward) + forward pass
# ----------------------------------------------------------------------------
def init_mlp_params(key, input_dim, hidden_dims, dtype=jnp.float32):
    """Same parameter shapes as the PyTorch module (Kaiming-uniform-ish)."""
    in_dims = [input_dim] + hidden_dims[:-1]
    out_dims = hidden_dims
    params = []
    for i_d, o_d in zip(in_dims, out_dims):
        key, kw, kb = jax.random.split(key, 3)
        bound = 1.0 / math.sqrt(i_d)
        w = jax.random.uniform(kw, (i_d, o_d), dtype, minval=-bound, maxval=bound)
        b = jax.random.uniform(kb, (o_d,), jnp.float32, minval=-bound, maxval=bound)
        params.append((w, b))
    return params


def prepare_mlp(params, input_dim, *, compute_dtype=None, mode="auto"):
    """Pad (lane-dense) and cast the parameters ONCE.  The returned dict is
    reused across forward calls so no per-call jnp.pad/astype HBM traffic.

    compute_dtype: None -> bfloat16 MXU inputs with f32 accumulation (fast on
    v6e/v7x, positive on v5e).  Pass jnp.float32 to keep full f32 numerics.
    """
    if compute_dtype is None:
        compute_dtype = jnp.bfloat16
    compute_dtype = jnp.dtype(compute_dtype)

    dims = [input_dim] + [w.shape[1] for w, _ in params]
    n_layers = len(params)

    if mode == "auto":
        pdims128 = [_round_up(d, LANE) for d in dims]
        # Weights single-buffered (Buffered(1)); biases f32.
        param_bytes = sum(pdims128[l] * pdims128[l + 1] * compute_dtype.itemsize
                          + pdims128[l + 1] * 4 for l in range(n_layers))
        bt = 512  # worst-case batch tile
        act_bytes = 2 * bt * (pdims128[0] + pdims128[-1]) * 4   # x/out double-buffered
        scratch = 4 * bt * max(pdims128) * 4                    # live h + Mosaic temps headroom
        footprint = param_bytes + act_bytes + scratch
        mode = "fused" if footprint <= _FUSED_VMEM_BUDGET else "tiled"

    pad = (lambda d: _round_up(d, LANE)) if mode == "fused" else _pad_feat_tiled
    pdims = [pad(d) for d in dims]

    flat = []
    for l, (w, b) in enumerate(params):
        flat.append(_pad2d(w.astype(compute_dtype), pdims[l], pdims[l + 1]))
        flat.append(_pad2d(b.reshape(1, -1).astype(jnp.float32), 1, pdims[l + 1]))

    return dict(mode=mode, compute_dtype=compute_dtype, dims=dims,
                pdims=pdims, flat=flat)


def mlp_apply(prepared, x, *, batch_tile=None):
    """Forward pass of MLPLayers with pre-prepared (padded/cast) parameters."""
    B, Din = x.shape
    dims, pdims, flat = prepared["dims"], prepared["pdims"], prepared["flat"]
    assert Din == dims[0], f"expected input dim {dims[0]}, got {Din}"
    out_dtype = x.dtype
    cdt = prepared["compute_dtype"]
    sub = _sublane(cdt)
    xc = x.astype(cdt)

    if prepared["mode"] == "fused":
        if batch_tile is None:
            if B > 2 * sub:
                # Keep >= 2 batch programs so both v7x TensorCores get work.
                batch_tile = min(512, _round_up((B + 1) // 2, sub))
            else:
                batch_tile = _round_up(B, sub)
        else:
            batch_tile = _round_up(batch_tile, sub)
        Bp = _round_up(B, batch_tile)
        xp = _pad2d(xc, Bp, pdims[0])
        try:
            out = _fused_apply(xp, flat, pdims, batch_tile, out_dtype,
                               single_buffer_weights=True)
        except Exception:
            # pl.Buffered(1) unsupported on this jax build -> default buffering.
            out = _fused_apply(xp, flat, pdims, batch_tile, out_dtype,
                               single_buffer_weights=False)
        return out[:B, :dims[-1]]

    # Tiled fallback: activations stay padded and in compute dtype across the
    # whole chain; slice back to logical shape only once at the end.
    tm = min(512, _round_up(B, sub))
    Bp = _round_up(B, tm)
    h = _pad2d(xc, Bp, pdims[0])
    n_layers = len(flat) // 2
    for l in range(n_layers):
        layer_out_dtype = cdt if (l + 1) < n_layers else out_dtype
        h = _linear_relu_tiled_padded(h, flat[2 * l], flat[2 * l + 1], tm,
                                      layer_out_dtype)
    return h[:B, :dims[-1]]


def mlp_forward(x, params, *, compute_dtype=None, mode="auto", batch_tile=None):
    """One-shot convenience wrapper (prepares params on every call; prefer
    prepare_mlp + mlp_apply when calling repeatedly)."""
    prepared = prepare_mlp(params, x.shape[1], compute_dtype=compute_dtype,
                           mode=mode)
    return mlp_apply(prepared, x, batch_tile=batch_tile)


# ----------------------------------------------------------------------------
# Self-test
# ----------------------------------------------------------------------------
if __name__ == "__main__":
    HI = jax.lax.Precision.HIGHEST

    batch, input_dim = 8, 32
    hidden_dims = [64, 32, 16]

    key = jax.random.PRNGKey(0)
    key, kx = jax.random.split(key)
    x = jax.random.normal(kx, (batch, input_dim), jnp.float32)
    params = init_mlp_params(key, input_dim, hidden_dims)

    # 1) Fused path, explicit f32 compute (opt-out of the bf16 default).
    prep_f32 = prepare_mlp(params, input_dim, compute_dtype=jnp.float32)
    assert prep_f32["mode"] == "fused"
    out = jax.block_until_ready(mlp_apply(prep_f32, x))
    ref = x
    for w, b in params:
        ref = jnp.maximum(jnp.dot(ref, w, precision=HI) + b, 0.0)
    assert out.shape == (batch, hidden_dims[-1])
    assert jnp.allclose(out, ref, atol=1e-4, rtol=1e-4)

    # Reuse the cached prepared params (padding/casting hoisted out of forward).
    out2 = jax.block_until_ready(mlp_apply(prep_f32, x + 1.0))
    ref2 = x + 1.0
    for w, b in params:
        ref2 = jnp.maximum(jnp.dot(ref2, w, precision=HI) + b, 0.0)
    assert jnp.allclose(out2, ref2, atol=1e-4, rtol=1e-4)

    # 2) Fused path, default bf16 MXU compute with f32 accumulation.
    out_bf16 = jax.block_until_ready(mlp_forward(x, params))
    ref_bf16 = x
    for w, b in params:
        ref_bf16 = jnp.maximum(
            jnp.dot(ref_bf16.astype(jnp.bfloat16), w.astype(jnp.bfloat16),
                    preferred_element_type=jnp.float32) + b, 0.0)
    assert out_bf16.shape == (batch, hidden_dims[-1])
    assert jnp.allclose(out_bf16, ref_bf16, atol=2e-2, rtol=2e-2)

    # 3) Forced per-layer tiled fallback path (large-layer regime), ragged dims.
    key, kxl = jax.random.split(key)
    xl = jax.random.normal(kxl, (96, 200), jnp.float32)
    params_l = init_mlp_params(key, 200, [384, 256])
    out_l = jax.block_until_ready(
        mlp_forward(xl, params_l, compute_dtype=jnp.float32, mode="tiled"))
    ref_l = xl
    for w, b in params_l:
        ref_l = jnp.maximum(jnp.dot(ref_l, w, precision=HI) + b, 0.0)
    assert out_l.shape == (96, 256)
    assert jnp.allclose(out_l, ref_l, atol=2e-4, rtol=2e-4)

    print("KERNEL_OK")
</pallas_src>

<mosaic_0001>
module attributes {stable_mosaic.version = 11 : i64} {
  func.func @_fused_mlp_kernel(%arg0: i32, %arg1: memref<8x128xf32, #tpu.memory_space<vmem>>, %arg2: memref<128x128xf32, #tpu.memory_space<vmem>>, %arg3: memref<1x128xf32, #tpu.memory_space<vmem>>, %arg4: memref<128x128xf32, #tpu.memory_space<vmem>>, %arg5: memref<1x128xf32, #tpu.memory_space<vmem>>, %arg6: memref<128x128xf32, #tpu.memory_space<vmem>>, %arg7: memref<1x128xf32, #tpu.memory_space<vmem>>, %arg8: memref<8x128xf32, #tpu.memory_space<vmem>>) attributes {dimension_semantics = [#tpu.dimension_semantics<parallel>], iteration_bounds = array<i64: 1>, scalar_prefetch = 0 : i64, scratch_operands = 0 : i64, tpu.core_type = #tpu.core_type<tc>, window_params = [{transform_indices = @transform_0, window_bounds = array<i64: 8, 128>}, {pipeline_mode = #tpu.pipeline_mode<synchronous>, transform_indices = @transform_1, window_bounds = array<i64: 128, 128>}, {pipeline_mode = #tpu.pipeline_mode<synchronous>, transform_indices = @transform_2, window_bounds = array<i64: 1, 128>}, {pipeline_mode = #tpu.pipeline_mode<synchronous>, transform_indices = @transform_3, window_bounds = array<i64: 128, 128>}, {pipeline_mode = #tpu.pipeline_mode<synchronous>, transform_indices = @transform_4, window_bounds = array<i64: 1, 128>}, {pipeline_mode = #tpu.pipeline_mode<synchronous>, transform_indices = @transform_5, window_bounds = array<i64: 128, 128>}, {pipeline_mode = #tpu.pipeline_mode<synchronous>, transform_indices = @transform_6, window_bounds = array<i64: 1, 128>}, {transform_indices = @transform_7, window_bounds = array<i64: 8, 128>}]} {
    %c0 = arith.constant 0 : index
    %c0_0 = arith.constant 0 : index
    %0 = vector.load %arg1[%c0, %c0_0] : memref<8x128xf32, #tpu.memory_space<vmem>>, vector<8x128xf32>
    %c0_1 = arith.constant 0 : index
    %c0_2 = arith.constant 0 : index
    %1 = vector.load %arg2[%c0_1, %c0_2] : memref<128x128xf32, #tpu.memory_space<vmem>>, vector<128x128xf32>
    %c0_3 = arith.constant 0 : index
    %c0_4 = arith.constant 0 : index
    %2 = vector.load %arg3[%c0_3, %c0_4] : memref<1x128xf32, #tpu.memory_space<vmem>>, vector<1x128xf32>
    %cst = arith.constant dense<0.000000e+00> : vector<8x128xf32>
    %3 = tpu.matmul %0, %1, %cst {dimension_numbers = #tpu.dot_dimension_numbers<[1], [0], [0], [1], [0, 0, 1, 1], [], []>} : vector<8x128xf32>, vector<128x128xf32>, vector<8x128xf32> -> vector<8x128xf32>
    %4 = vector.broadcast %2 : vector<1x128xf32> to vector<8x128xf32>
    %5 = arith.addf %3, %4 : vector<8x128xf32>
    %cst_5 = arith.constant 0.000000e+00 : f32
    %6 = vector.broadcast %cst_5 : f32 to vector<8x128xf32>
    %7 = arith.maximumf %5, %6 : vector<8x128xf32>
    %c0_6 = arith.constant 0 : index
    %c0_7 = arith.constant 0 : index
    %8 = vector.load %arg4[%c0_6, %c0_7] : memref<128x128xf32, #tpu.memory_space<vmem>>, vector<128x128xf32>
    %c0_8 = arith.constant 0 : index
    %c0_9 = arith.constant 0 : index
    %9 = vector.load %arg5[%c0_8, %c0_9] : memref<1x128xf32, #tpu.memory_space<vmem>>, vector<1x128xf32>
    %cst_10 = arith.constant dense<0.000000e+00> : vector<8x128xf32>
    %10 = tpu.matmul %7, %8, %cst_10 {dimension_numbers = #tpu.dot_dimension_numbers<[1], [0], [0], [1], [0, 0, 1, 1], [], []>} : vector<8x128xf32>, vector<128x128xf32>, vector<8x128xf32> -> vector<8x128xf32>
    %11 = vector.broadcast %9 : vector<1x128xf32> to vector<8x128xf32>
    %12 = arith.addf %10, %11 : vector<8x128xf32>
    %cst_11 = arith.constant 0.000000e+00 : f32
    %13 = vector.broadcast %cst_11 : f32 to vector<8x128xf32>
    %14 = arith.maximumf %12, %13 : vector<8x128xf32>
    %c0_12 = arith.constant 0 : index
    %c0_13 = arith.constant 0 : index
    %15 = vector.load %arg6[%c0_12, %c0_13] : memref<128x128xf32, #tpu.memory_space<vmem>>, vector<128x128xf32>
    %c0_14 = arith.constant 0 : index
    %c0_15 = arith.constant 0 : index
    %16 = vector.load %arg7[%c0_14, %c0_15] : memref<1x128xf32, #tpu.memory_space<vmem>>, vector<1x128xf32>
    %cst_16 = arith.constant dense<0.000000e+00> : vector<8x128xf32>
    %17 = tpu.matmul %14, %15, %cst_16 {dimension_numbers = #tpu.dot_dimension_numbers<[1], [0], [0], [1], [0, 0, 1, 1], [], []>} : vector<8x128xf32>, vector<128x128xf32>, vector<8x128xf32> -> vector<8x128xf32>
    %18 = vector.broadcast %16 : vector<1x128xf32> to vector<8x128xf32>
    %19 = arith.addf %17, %18 : vector<8x128xf32>
    %cst_17 = arith.constant 0.000000e+00 : f32
    %20 = vector.broadcast %cst_17 : f32 to vector<8x128xf32>
    %21 = arith.maximumf %19, %20 : vector<8x128xf32>
    %c0_18 = arith.constant 0 : index
    %c0_19 = arith.constant 0 : index
    %22 = vector.load %arg8[%c0_18, %c0_19] : memref<8x128xf32, #tpu.memory_space<vmem>>, vector<8x128xf32>
    tpu.vector_store %arg8[%c0_18, %c0_19], %21 {strides = array<i32>} : memref<8x128xf32, #tpu.memory_space<vmem>>, vector<8x128xf32>,
    return
  }
  func.func @transform_0(%arg0: i32) -> (i32, i32) {
    %c0_i32 = arith.constant 0 : i32
    %c0_i32_0 = arith.constant 0 : i32
    return %arg0, %c0_i32 : i32, i32
  }
  func.func @transform_1(%arg0: i32) -> (i32, i32) {
    %c0_i32 = arith.constant 0 : i32
    %c0_i32_0 = arith.constant 0 : i32
    %c0_i32_1 = arith.constant 0 : i32
    return %c0_i32, %c0_i32_0 : i32, i32
  }
  func.func @transform_2(%arg0: i32) -> (i32, i32) {
    %c0_i32 = arith.constant 0 : i32
    %c0_i32_0 = arith.constant 0 : i32
    %c0_i32_1 = arith.constant 0 : i32
    return %c0_i32, %c0_i32_0 : i32, i32
  }
  func.func @transform_3(%arg0: i32) -> (i32, i32) {
    %c0_i32 = arith.constant 0 : i32
    %c0_i32_0 = arith.constant 0 : i32
    %c0_i32_1 = arith.constant 0 : i32
    return %c0_i32, %c0_i32_0 : i32, i32
  }
  func.func @transform_4(%arg0: i32) -> (i32, i32) {
    %c0_i32 = arith.constant 0 : i32
    %c0_i32_0 = arith.constant 0 : i32
    %c0_i32_1 = arith.constant 0 : i32
    return %c0_i32, %c0_i32_0 : i32, i32
  }
  func.func @transform_5(%arg0: i32) -> (i32, i32) {
    %c0_i32 = arith.constant 0 : i32
    %c0_i32_0 = arith.constant 0 : i32
    %c0_i32_1 = arith.constant 0 : i32
    return %c0_i32, %c0_i32_0 : i32, i32
  }
  func.func @transform_6(%arg0: i32) -> (i32, i32) {
    %c0_i32 = arith.constant 0 : i32
    %c0_i32_0 = arith.constant 0 : i32
    %c0_i32_1 = arith.constant 0 : i32
    return %c0_i32, %c0_i32_0 : i32, i32
  }
  func.func @transform_7(%arg0: i32) -> (i32, i32) {
    %c0_i32 = arith.constant 0 : i32
    %c0_i32_0 = arith.constant 0 : i32
    return %arg0, %c0_i32 : i32, i32
  }
}

module attributes {stable_mosaic.version = 11 : i64} {
  func.func @_fused_mlp_kernel(%arg0: i32, %arg1: memref<8x128xf32, #tpu.memory_space<vmem>>, %arg2: memref<128x128xf32, #tpu.memory_space<vmem>>, %arg3: memref<1x128xf32, #tpu.memory_space<vmem>>, %arg4: memref<128x128xf32, #tpu.memory_space<vmem>>, %arg5: memref<1x128xf32, #tpu.memory_space<vmem>>, %arg6: memref<128x128xf32, #tpu.memory_space<vmem>>, %arg7: memref<1x128xf32, #tpu.memory_space<vmem>>, %arg8: memref<8x128xf32, #tpu.memory_space<vmem>>) attributes {dimension_semantics = [#tpu.dimension_semantics<parallel>], iteration_bounds = array<i64: 1>, scalar_prefetch = 0 : i64, scratch_operands = 0 : i64, tpu.core_type = #tpu.core_type<tc>, window_params = [{transform_indices = @transform_0, window_bounds = array<i64: 8, 128>}, {pipeline_mode = #tpu.pipeline_mode<synchronous>, transform_indices = @transform_1, window_bounds = array<i64: 128, 128>}, {pipeline_mode = #tpu.pipeline_mode<synchronous>, transform_indices = @transform_2, window_bounds = array<i64: 1, 128>}, {pipeline_mode = #tpu.pipeline_mode<synchronous>, transform_indices = @transform_3, window_bounds = array<i64: 128, 128>}, {pipeline_mode = #tpu.pipeline_mode<synchronous>, transform_indices = @transform_4, window_bounds = array<i64: 1, 128>}, {pipeline_mode = #tpu.pipeline_mode<synchronous>, transform_indices = @transform_5, window_bounds = array<i64: 128, 128>}, {pipeline_mode = #tpu.pipeline_mode<synchronous>, transform_indices = @transform_6, window_bounds = array<i64: 1, 128>}, {transform_indices = @transform_7, window_bounds = array<i64: 8, 128>}]} {
    %c0 = arith.constant 0 : index
    %c0_0 = arith.constant 0 : index
    %0 = vector.load %arg1[%c0, %c0_0] : memref<8x128xf32, #tpu.memory_space<vmem>>, vector<8x128xf32>
    %c0_1 = arith.constant 0 : index
    %c0_2 = arith.constant 0 : index
    %1 = vector.load %arg2[%c0_1, %c0_2] : memref<128x128xf32, #tpu.memory_space<vmem>>, vector<128x128xf32>
    %c0_3 = arith.constant 0 : index
    %c0_4 = arith.constant 0 : index
    %2 = vector.load %arg3[%c0_3, %c0_4] : memref<1x128xf32, #tpu.memory_space<vmem>>, vector<1x128xf32>
    %cst = arith.constant dense<0.000000e+00> : vector<8x128xf32>
    %3 = tpu.matmul %0, %1, %cst {dimension_numbers = #tpu.dot_dimension_numbers<[1], [0], [0], [1], [0, 0, 1, 1], [], []>} : vector<8x128xf32>, vector<128x128xf32>, vector<8x128xf32> -> vector<8x128xf32>
    %4 = vector.broadcast %2 : vector<1x128xf32> to vector<8x128xf32>
    %5 = arith.addf %3, %4 : vector<8x128xf32>
    %cst_5 = arith.constant 0.000000e+00 : f32
    %6 = vector.broadcast %cst_5 : f32 to vector<8x128xf32>
    %7 = arith.maximumf %5, %6 : vector<8x128xf32>
    %c0_6 = arith.constant 0 : index
    %c0_7 = arith.constant 0 : index
    %8 = vector.load %arg4[%c0_6, %c0_7] : memref<128x128xf32, #tpu.memory_space<vmem>>, vector<128x128xf32>
    %c0_8 = arith.constant 0 : index
    %c0_9 = arith.constant 0 : index
    %9 = vector.load %arg5[%c0_8, %c0_9] : memref<1x128xf32, #tpu.memory_space<vmem>>, vector<1x128xf32>
    %cst_10 = arith.constant dense<0.000000e+00> : vector<8x128xf32>
    %10 = tpu.matmul %7, %8, %cst_10 {dimension_numbers = #tpu.dot_dimension_numbers<[1], [0], [0], [1], [0, 0, 1, 1], [], []>} : vector<8x128xf32>, vector<128x128xf32>, vector<8x128xf32> -> vector<8x128xf32>
    %11 = vector.broadcast %9 : vector<1x128xf32> to vector<8x128xf32>
    %12 = arith.addf %10, %11 : vector<8x128xf32>
    %cst_11 = arith.constant 0.000000e+00 : f32
    %13 = vector.broadcast %cst_11 : f32 to vector<8x128xf32>
    %14 = arith.maximumf %12, %13 : vector<8x128xf32>
    %c0_12 = arith.constant 0 : index
    %c0_13 = arith.constant 0 : index
    %15 = vector.load %arg6[%c0_12, %c0_13] : memref<128x128xf32, #tpu.memory_space<vmem>>, vector<128x128xf32>
    %c0_14 = arith.constant 0 : index
    %c0_15 = arith.constant 0 : index
    %16 = vector.load %arg7[%c0_14, %c0_15] : memref<1x128xf32, #tpu.memory_space<vmem>>, vector<1x128xf32>
    %cst_16 = arith.constant dense<0.000000e+00> : vector<8x128xf32>
    %17 = tpu.matmul %14, %15, %cst_16 {dimension_numbers = #tpu.dot_dimension_numbers<[1], [0], [0], [1], [0, 0, 1, 1], [], []>} : vector<8x128xf32>, vector<128x128xf32>, vector<8x128xf32> -> vector<8x128xf32>
    %18 = vector.broadcast %16 : vector<1x128xf32> to vector<8x128xf32>
    %19 = arith.addf %17, %18 : vector<8x128xf32>
    %cst_17 = arith.constant 0.000000e+00 : f32
    %20 = vector.broadcast %cst_17 : f32 to vector<8x128xf32>
    %21 = arith.maximumf %19, %20 : vector<8x128xf32>
    %c0_18 = arith.constant 0 : index
    %c0_19 = arith.constant 0 : index
    %22 = vector.load %arg8[%c0_18, %c0_19] : memref<8x128xf32, #tpu.memory_space<vmem>>, vector<8x128xf32>
    tpu.vector_store %arg8[%c0_18, %c0_19], %21 {strides = array<i32>} : memref<8x128xf32, #tpu.memory_space<vmem>>, vector<8x128xf32>,
    return
  }
  func.func @transform_0(%arg0: i32) -> (i32, i32) {
    %c0_i32 = arith.constant 0 : i32
    %c0_i32_0 = arith.constant 0 : i32
    return %arg0, %c0_i32 : i32, i32
  }
  func.func @transform_1(%arg0: i32) -> (i32, i32) {
    %c0_i32 = arith.constant 0 : i32
    %c0_i32_0 = arith.constant 0 : i32
    %c0_i32_1 = arith.constant 0 : i32
    return %c0_i32, %c0_i32_0 : i32, i32
  }
  func.func @transform_2(%arg0: i32) -> (i32, i32) {
    %c0_i32 = arith.constant 0 : i32
    %c0_i32_0 = arith.constant 0 : i32
    %c0_i32_1 = arith.constant 0 : i32
    return %c0_i32, %c0_i32_0 : i32, i32
  }
  func.func @transform_3(%arg0: i32) -> (i32, i32) {
    %c0_i32 = arith.constant 0 : i32
    %c0_i32_0 = arith.constant 0 : i32
    %c0_i32_1 = arith.constant 0 : i32
    return %c0_i32, %c0_i32_0 : i32, i32
  }
  func.func @transform_4(%arg0: i32) -> (i32, i32) {
    %c0_i32 = arith.constant 0 : i32
    %c0_i32_0 = arith.constant 0 : i32
    %c0_i32_1 = arith.constant 0 : i32
    return %c0_i32, %c0_i32_0 : i32, i32
  }
  func.func @transform_5(%arg0: i32) -> (i32, i32) {
    %c0_i32 = arith.constant 0 : i32
    %c0_i32_0 = arith.constant 0 : i32
    %c0_i32_1 = arith.constant 0 : i32
    return %c0_i32, %c0_i32_0 : i32, i32
  }
  func.func @transform_6(%arg0: i32) -> (i32, i32) {
    %c0_i32 = arith.constant 0 : i32
    %c0_i32_0 = arith.constant 0 : i32
    %c0_i32_1 = arith.constant 0 : i32
    return %c0_i32, %c0_i32_0 : i32, i32
  }
  func.func @transform_7(%arg0: i32) -> (i32, i32) {
    %c0_i32 = arith.constant 0 : i32
    %c0_i32_0 = arith.constant 0 : i32
    return %arg0, %c0_i32 : i32, i32
  }
}

</mosaic_0001>

<bundles_post_ra>
// kernel: tpu_custom_call.1
= control target key start
LH: loop header
LB: loop body
LE: loop exit
PB: predicated region body
PF: predicated region fallthrough
CT: control target
= control target key end

     0   :  { %12 = vsyncpa [#allocation3], 0  ;;  %s793_s0 = inlined_call_operand.hbm [shape: f32[8,128], index: 0, kind: input, shape index: {}]   ;;  %s794_s1 = inlined_call_operand.hbm [shape: f32[128,128], index: 1, kind: input, shape index: {}]   ;;  %s795_s2 = inlined_call_operand.vmem [shape: f32[1,128], index: 2, kind: input, shape index: {}]   ;;  %s796_s3 = inlined_call_operand.hbm [shape: f32[128,128], index: 3, kind: input, shape index: {}]   ;;  %s797_s4 = inlined_call_operand.vmem [shape: f32[1,128], index: 4, kind: input, shape index: {}]   ;;  %s798_s5 = inlined_call_operand.hbm [shape: f32[128,128], index: 5, kind: input, shape index: {}]   ;;  %s799_s6 = inlined_call_operand.vmem [shape: f32[1,128], index: 6, kind: input, shape index: {}]   ;;  %s800_s7 = inlined_call_operand.hbm [shape: f32[8,128], index: 7, kind: output, shape index: {}]  }
   0x1   :  { %13 = vsyncpa [#allocation6], 0 }
   0x2   :  { %14 = vsyncpa [#allocation9], 0 }
   0x3   :  { %15 = vsyncpa [#allocation4], 0  ;;  %s657_s24 = smov [#allocation5]  }
   0x4   :  { %s31_s25 = sshll.u32 %s657_s24, 4  ;;  %s32_s25 = int_to_ptr.vmem [resolvable:$true] %s31_s25 }
   0x5   :  { %s557_s26 = scalar_lea.vmem %s32_s25, 2048  ;;  %p562_p1 = scmp.lt.s32.totalorder %s32_s25, %s32_s25 }
   0x6   :  { %p558_p0 = scmp.ne.s32.totalorder %s32_s25, %s557_s26  ;;  %p563_p2 = scmp.lt.s32.totalorder %s557_s26, %s557_s26 }
   0x8   :  { %p564_p3 = por %p563_p2, %p562_p1 }
   0xa   :  { %p565_p4 = pnand %p564_p3, %p558_p0 }
   0xc   :  { %568 = shalt.err (!%p565_p4)
}
   0xd   :  { %s658_s27 = smov 128   ;;  %s659_s28 = smov 8  }
   0xe   :  { %37 = dma.hbm_to_vmem [thread:$0]  %s794_s1, 2048, %s32_s25, [#allocation6], %s658_s27, %s658_s27, %s659_s28  }
   0xf   :  { %s660_s8 = smov [#allocation2]   ;;  %s661_s10 = smov [#allocation7]  }
  0x10   :  { %s22_s9 = sshll.u32 %s660_s8, 4  ;;  %s45_s11 = sshll.u32 %s661_s10, 4  ;;  %s23_s9 = int_to_ptr.vmem [resolvable:$true] %s22_s9  ;;  %s46_s11 = int_to_ptr.vmem [resolvable:$true] %s45_s11 }
  0x11   :  { %s577_s12 = scalar_lea.vmem %s23_s9, 128  ;;  %p582_p6 = scmp.lt.s32.totalorder %s23_s9, %s23_s9 }
  0x12   :  { %p578_p5 = scmp.ne.s32.totalorder %s23_s9, %s577_s12  ;;  %p583_p7 = scmp.lt.s32.totalorder %s577_s12, %s577_s12 }
  0x14   :  { %p584_p8 = por %p583_p7, %p582_p6 }
  0x16   :  { %p585_p9 = pnand %p584_p8, %p578_p5 }
  0x18   :  { %588 = shalt.err (!%p585_p9)
}
  0x19   :  { %25 = dma.hbm_to_vmem [thread:$0]  %s793_s0, 128, %s23_s9, [#allocation3]  }
  0x1a   :  { %s597_s15 = scalar_lea.vmem %s46_s11, 2048  ;;  %p602_p11 = scmp.lt.s32.totalorder %s46_s11, %s46_s11 }
  0x1b   :  { %p598_p10 = scmp.ne.s32.totalorder %s46_s11, %s597_s15  ;;  %p603_p12 = scmp.lt.s32.totalorder %s597_s15, %s597_s15 }
  0x1d   :  { %p604_p13 = por %p603_p12, %p602_p11 }
  0x1f   :  { %p605_p0 = pnand %p604_p13, %p598_p10 }
  0x21   :  { %608 = shalt.err (!%p605_p0)
}
  0x22   :  { %51 = dma.hbm_to_vmem [thread:$0]  %s796_s3, 2048, %s46_s11, [#allocation6], %s658_s27, %s658_s27, %s659_s28  }
  0x23   :  { %s662_s17 = smov [#allocation8]  }
  0x24   :  { %s59_s18 = sshll.u32 %s662_s17, 4  ;;  %s60_s18 = int_to_ptr.vmem [resolvable:$true] %s59_s18 }
  0x25   :  { %s617_s19 = scalar_lea.vmem %s60_s18, 2048  ;;  %p622_p2 = scmp.lt.s32.totalorder %s60_s18, %s60_s18 }
  0x26   :  { %p618_p1 = scmp.ne.s32.totalorder %s60_s18, %s617_s19  ;;  %p623_p3 = scmp.lt.s32.totalorder %s617_s19, %s617_s19 }
  0x28   :  { %p624_p4 = por %p623_p3, %p622_p2 }
  0x2a   :  { %p625_p5 = pnand %p624_p4, %p618_p1 }
  0x2c   :  { %628 = shalt.err (!%p625_p5)
}
  0x2d   :  { %65 = dma.hbm_to_vmem [thread:$0]  %s798_s5, 2048, %s60_s18, [#allocation9], %s658_s27, %s658_s27, %s659_s28  }
  0x2e   :  { %649 = dma.done.wait [#allocation3], 128  }
  0x2f   :  { %650 = vsyncadd [#allocation3], 4294967168 }
  0x30   :  { %651 = dma.done.wait [#allocation6], 4096  }
  0x31   :  { %652 = vsyncadd [#allocation6], 4294963200 }
  0x32   :  { %653 = dma.done.wait [#allocation9], 2048  }
  0x33   :  { %654 = vsyncadd [#allocation9], 4294965248  ;;  %v663_v0 = vmov 0.0   ;;  %vm664_vm0 = vmmov 0   ;;  %v96_v1 = vld [vmem:[#allocation5 + $0x78] sm:$0xff]  ;;  %v95_v2 = vld [vmem:[#allocation5 + $0x70] sm:$0xff] }
  0x34   :  { %435 = vmatprep.subr.mxu0 %v663_v0  ;;  %467 = vmatprep.mubr.msk.f32.mxu0 %vm664_vm0, %v663_v0  ;;  %v94_v3 = vld [vmem:[#allocation5 + $0x68] sm:$0xff]  ;;  %v93_v4 = vld [vmem:[#allocation5 + $0x60] sm:$0xff]  ;;  %v190_v5 = vld [vmem:[#allocation7 + $0x78] sm:$0xff]  ;;  %s665_s24 = smov [#allocation10]  }
  0x35   :  { %470 = vmatprep.subr.mxu1 %v663_v0  ;;  %502 = vmatprep.mubr.msk.f32.mxu1 %vm664_vm0, %v663_v0  ;;  %v92_v6 = vld [vmem:[#allocation5 + $0x58] sm:$0xff]  ;;  %v189_v7 = vld [vmem:[#allocation7 + $0x70] sm:$0xff]  ;;  %v188_v8 = vld [vmem:[#allocation7 + $0x68] sm:$0xff]  ;;  %s370_s25 = sshll.u32 %s665_s24, 4  ;;  %s371_s25 = int_to_ptr.vmem [resolvable:$true] %s370_s25 }
  0x36   :  { %436 = vmatpush3.msra.mxu0 %v96_v1  ;;  %471 = vmatpush3.msra.mxu1 %v190_v5  ;;  %v91_v9 = vld [vmem:[#allocation5 + $0x50] sm:$0xff]  ;;  %v187_v10 = vld [vmem:[#allocation7 + $0x60] sm:$0xff]  ;;  %v90_v11 = vld [vmem:[#allocation5 + $0x48] sm:$0xff]  ;;  %s629_s26 = scalar_lea.vmem %s371_s25, 128  ;;  %p634_p7 = scmp.lt.s32.totalorder %s371_s25, %s371_s25 }
  0x37   :  { %437 = vmatprep.subr.mxu0 %v663_v0  ;;  %472 = vmatprep.subr.mxu1 %v663_v0  ;;  %v186_v12 = vld [vmem:[#allocation7 + $0x58] sm:$0xff]  ;;  %v89_v13 = vld [vmem:[#allocation5 + $0x40] sm:$0xff]  ;;  %v185_v14 = vld [vmem:[#allocation7 + $0x50] sm:$0xff]  ;;  %p630_p6 = scmp.ne.s32.totalorder %s371_s25, %s629_s26  ;;  %p635_p8 = scmp.lt.s32.totalorder %s629_s26, %s629_s26 }
  0x38   :  { %438 = vmatpush3.msra.mxu0 %v95_v2  ;;  %473 = vmatpush3.msra.mxu1 %v189_v7  ;;  %v88_v15 = vld [vmem:[#allocation5 + $0x38] sm:$0xff]  ;;  %v184_v16 = vld [vmem:[#allocation7 + $0x48] sm:$0xff]  ;;  %v87_v17 = vld [vmem:[#allocation5 + $0x30] sm:$0xff] }
  0x39   :  { %439 = vmatprep.subr.mxu0 %v663_v0  ;;  %474 = vmatprep.subr.mxu1 %v663_v0  ;;  %v183_v18 = vld [vmem:[#allocation7 + $0x40] sm:$0xff]  ;;  %v86_v19 = vld [vmem:[#allocation5 + $0x28] sm:$0xff]  ;;  %v182_v20 = vld [vmem:[#allocation7 + $0x38] sm:$0xff]  ;;  %p636_p9 = por %p635_p8, %p634_p7 }
  0x3a   :  { %440 = vmatpush3.msra.mxu0 %v94_v3  ;;  %475 = vmatpush3.msra.mxu1 %v188_v8  ;;  %v85_v21 = vld [vmem:[#allocation5 + $0x20] sm:$0xff]  ;;  %v181_v22 = vld [vmem:[#allocation7 + $0x30] sm:$0xff]  ;;  %v84_v23 = vld [vmem:[#allocation5 + $0x18] sm:$0xff] }
  0x3b   :  { %441 = vmatprep.subr.mxu0 %v663_v0  ;;  %476 = vmatprep.subr.mxu1 %v663_v0  ;;  %v180_v24 = vld [vmem:[#allocation7 + $0x28] sm:$0xff]  ;;  %v83_v25 = vld [vmem:[#allocation5 + $0x10] sm:$0xff]  ;;  %v179_v26 = vld [vmem:[#allocation7 + $0x20] sm:$0xff]  ;;  %p637_p10 = pnand %p636_p9, %p630_p6 }
  0x3c   :  { %442 = vmatpush3.msra.mxu0 %v93_v4  ;;  %477 = vmatpush3.msra.mxu1 %v187_v10  ;;  %v82_v27 = vld [vmem:[#allocation5 + $0x8] sm:$0xff]  ;;  %v178_v28 = vld [vmem:[#allocation7 + $0x18] sm:$0xff]  ;;  %v81_v29 = vld [vmem:[#allocation5] sm:$0xff] }
  0x3d   :  { %443 = vmatprep.subr.mxu0 %v663_v0  ;;  %478 = vmatprep.subr.mxu1 %v663_v0  ;;  %v80_v30 = vld [vmem:[#allocation2] sm:$0xff]  ;;  %v177_v31 = vld [vmem:[#allocation7 + $0x10] sm:$0xff]  ;;  %v176_v32 = vld [vmem:[#allocation7 + $0x8] sm:$0xff] }
  0x3e   :  { %444 = vmatpush3.msra.mxu0 %v92_v6  ;;  %479 = vmatpush3.msra.mxu1 %v186_v12  ;;  %v175_v33 = vld [vmem:[#allocation7] sm:$0xff]  ;;  %v284_v34 = vld [vmem:[#allocation8 + $0x78] sm:$0xff]  ;;  %v283_v35 = vld [vmem:[#allocation8 + $0x70] sm:$0xff] }
  0x3f   :  { %445 = vmatprep.subr.mxu0 %v663_v0  ;;  %480 = vmatprep.subr.mxu1 %v663_v0  ;;  %v282_v36 = vld [vmem:[#allocation8 + $0x68] sm:$0xff]  ;;  %v281_v37 = vld [vmem:[#allocation8 + $0x60] sm:$0xff]  ;;  %v280_v38 = vld [vmem:[#allocation8 + $0x58] sm:$0xff] }
  0x40   :  { %446 = vmatpush3.msra.mxu0 %v91_v9  ;;  %481 = vmatpush3.msra.mxu1 %v185_v14  ;;  %v279_v39 = vld [vmem:[#allocation8 + $0x50] sm:$0xff]  ;;  %v278_v40 = vld [vmem:[#allocation8 + $0x48] sm:$0xff]  ;;  %v277_v41 = vld [vmem:[#allocation8 + $0x40] sm:$0xff] }
  0x41   :  { %447 = vmatprep.subr.mxu0 %v663_v0  ;;  %482 = vmatprep.subr.mxu1 %v663_v0  ;;  %v276_v42 = vld [vmem:[#allocation8 + $0x38] sm:$0xff]  ;;  %v275_v43 = vld [vmem:[#allocation8 + $0x30] sm:$0xff]  ;;  %v274_v44 = vld [vmem:[#allocation8 + $0x28] sm:$0xff] }
  0x42   :  { %448 = vmatpush3.msra.mxu0 %v90_v11  ;;  %483 = vmatpush3.msra.mxu1 %v184_v16  ;;  %v273_v45 = vld [vmem:[#allocation8 + $0x20] sm:$0xff]  ;;  %v272_v46 = vld [vmem:[#allocation8 + $0x18] sm:$0xff]  ;;  %v271_v52 = vld [vmem:[#allocation8 + $0x10] sm:$0xff] }
  0x43   :  { %449 = vmatprep.subr.mxu0 %v663_v0  ;;  %484 = vmatprep.subr.mxu1 %v663_v0  ;;  %v381_v47 = vld [vmem:[%s795_s2] ss:$0 sm:$0xff]  ;;  %v270_v53 = vld [vmem:[#allocation8 + $0x8] sm:$0xff]  ;;  %v269_v54 = vld [vmem:[#allocation8] sm:$0xff] }
  0x44   :  { %450 = vmatpush3.msra.mxu0 %v89_v13  ;;  %485 = vmatpush3.msra.mxu1 %v183_v18  ;;  %v382_v55 = vld [vmem:[%s797_s4] ss:$0 sm:$0xff] }
  0x45   :  { %451 = vmatprep.subr.mxu0 %v663_v0  ;;  %486 = vmatprep.subr.mxu1 %v663_v0  ;;  %v383_v60 = vld [vmem:[%s799_s6] ss:$0 sm:$0xff] }
  0x46   :  { %452 = vmatpush3.msra.mxu0 %v88_v15  ;;  %487 = vmatpush3.msra.mxu1 %v182_v20 }
  0x47   :  { %453 = vmatprep.subr.mxu0 %v663_v0  ;;  %488 = vmatprep.subr.mxu1 %v663_v0 }
  0x48   :  { %454 = vmatpush3.msra.mxu0 %v87_v17  ;;  %489 = vmatpush3.msra.mxu1 %v181_v22 }
  0x49   :  { %455 = vmatprep.subr.mxu0 %v663_v0  ;;  %490 = vmatprep.subr.mxu1 %v663_v0 }
  0x4a   :  { %456 = vmatpush3.msra.mxu0 %v86_v19  ;;  %491 = vmatpush3.msra.mxu1 %v180_v24 }
  0x4b   :  { %457 = vmatprep.subr.mxu0 %v663_v0  ;;  %492 = vmatprep.subr.mxu1 %v663_v0 }
  0x4c   :  { %458 = vmatpush3.msra.mxu0 %v85_v21  ;;  %493 = vmatpush3.msra.mxu1 %v179_v26 }
  0x4d   :  { %459 = vmatprep.subr.mxu0 %v663_v0  ;;  %494 = vmatprep.subr.mxu1 %v663_v0 }
  0x4e   :  { %460 = vmatpush3.msra.mxu0 %v84_v23  ;;  %495 = vmatpush3.msra.mxu1 %v178_v28 }
  0x4f   :  { %461 = vmatprep.subr.mxu0 %v663_v0  ;;  %496 = vmatprep.subr.mxu1 %v663_v0 }
  0x50   :  { %462 = vmatpush3.msra.mxu0 %v83_v25  ;;  %497 = vmatpush3.msra.mxu1 %v177_v31 }
  0x51   :  { %463 = vmatprep.subr.mxu0 %v663_v0  ;;  %498 = vmatprep.subr.mxu1 %v663_v0 }
  0x52   :  { %464 = vmatpush3.msra.mxu0 %v82_v27  ;;  %499 = vmatpush3.msra.mxu1 %v176_v32 }
  0x53   :  { %465 = vmatprep.subr.mxu0 %v663_v0  ;;  %500 = vmatprep.subr.mxu1 %v663_v0 }
  0x54   :  { %466 = vmatpush3.msra.mxu0 %v81_v29  ;;  %501 = vmatpush3.msra.mxu1 %v175_v33 }
  0x55   :  { %468 = vmatmul.mubr.f32.vlgmr.msra.gmra.mxu0 %v80_v30  ;;  %505 = vmatprep.subr.mxu0 %v663_v0 }
  0x56   :  { %537 = vmatprep.mubr.msk.f32.mxu0 %vm664_vm0, %v663_v0  ;;  %506 = vmatpush3.msra.mxu0 %v284_v34 }
  0x57   :  { %507 = vmatprep.subr.mxu0 %v663_v0 }
  0x58   :  { %508 = vmatpush3.msra.mxu0 %v283_v35 }
  0x59   :  { %509 = vmatprep.subr.mxu0 %v663_v0 }
  0x5a   :  { %510 = vmatpush3.msra.mxu0 %v282_v36 }
  0x5b   :  { %511 = vmatprep.subr.mxu0 %v663_v0 }
  0x5c   :  { %512 = vmatpush3.msra.mxu0 %v281_v37 }
  0x5d   :  { %513 = vmatprep.subr.mxu0 %v663_v0 }
  0x5e   :  { %514 = vmatpush3.msra.mxu0 %v280_v38 }
  0x5f   :  { %515 = vmatprep.subr.mxu0 %v663_v0 }
  0x60   :  { %516 = vmatpush3.msra.mxu0 %v279_v39 }
  0x61   :  { %517 = vmatprep.subr.mxu0 %v663_v0 }
  0x62   :  { %518 = vmatpush3.msra.mxu0 %v278_v40 }
  0x63   :  { %519 = vmatprep.subr.mxu0 %v663_v0 }
  0x64   :  { %520 = vmatpush3.msra.mxu0 %v277_v41 }
  0x65   :  { %521 = vmatprep.subr.mxu0 %v663_v0 }
  0x66   :  { %522 = vmatpush3.msra.mxu0 %v276_v42 }
  0x67   :  { %523 = vmatprep.subr.mxu0 %v663_v0 }
  0x68   :  { %524 = vmatpush3.msra.mxu0 %v275_v43 }
  0x69   :  { %525 = vmatprep.subr.mxu0 %v663_v0 }
  0x6a   :  { %526 = vmatpush3.msra.mxu0 %v274_v44 }
  0x6b   :  { %527 = vmatprep.subr.mxu0 %v663_v0 }
  0x6c   :  { %528 = vmatpush3.msra.mxu0 %v273_v45 }
  0x6d   :  { %529 = vmatprep.subr.mxu0 %v663_v0 }
  0x6e   :  { %530 = vmatpush3.msra.mxu0 %v272_v46 }
  0x6f   :  { %531 = vmatprep.subr.mxu0 %v663_v0 }
  0x70   :  { %532 = vmatpush3.msra.mxu0 %v271_v52 }
  0x71   :  { %533 = vmatprep.subr.mxu0 %v663_v0 }
  0x72   :  { %534 = vmatpush3.msra.mxu0 %v270_v53 }
  0x73   :  { %535 = vmatprep.subr.mxu0 %v663_v0 }
  0x74   :  { %536 = vmatpush3.msra.mxu0 %v269_v54 }
 0x115   :  { %v170_v48 = vpop.f32.mrf.mxu0 }
 0x116   :  { %v171_v49 = vadd.f32 %v381_v47, %v170_v48 }
 0x117   :  { %v469_v50 = vpop.f32.mrf.mxu0 }
 0x118   :  { %v174_v51 = vmax.f32 %v171_v49, 0.0 }
 0x11a   :  { %503 = vmatmul.mubr.f32.vlgmr.msra.gmra.mxu1 %v174_v51 }
 0x1da   :  { %v264_v56 = vpop.f32.mrf.mxu1 }
 0x1db   :  { %v265_v57 = vadd.f32 %v382_v55, %v264_v56 }
 0x1dc   :  { %v504_v58 = vpop.f32.mrf.mxu1 }
 0x1dd   :  { %v268_v59 = vmax.f32 %v265_v57, 0.0 }
 0x1df   :  { %538 = vmatmul.mubr.f32.vlgmr.msra.gmra.mxu0 %v268_v59 }
 0x29f   :  { %v358_v61 = vpop.f32.mrf.mxu0 }
 0x2a0   :  { %v359_v62 = vadd.f32 %v383_v60, %v358_v61 }
 0x2a1   :  { %v539_v63 = vpop.f32.mrf.mxu0 }
 0x2a2   :  { %v362_v0 = vmax.f32 %v359_v62, 0.0 }
 0x2a4   :  { %363 = vst [vmem:[#allocation10] sm:$0xff] %v362_v0 }
 0x2a5   :  { %640 = shalt.err (!%p637_p10)
}
 0x2a6   :  { %373 = dma.vmem_to_hbm [thread:$0]  %s371_s25, 128, %s800_s7, [#allocation4]  }
 0x2a7   :  { %655 = dma.done.wait [#allocation4], 128  }
 0x2a8   :  { %656 = vsyncadd [#allocation4], 4294967168 }
 0x2a9   :  { %377 = vsyncpa [#allocation3], 1 }
 0x2aa   :  { %378 = vsyncpa [#allocation6], 1 }
 0x2ab   :  { %379 = vsyncpa [#allocation9], 1 }
 0x2ac   :  { %380 = vsyncpa [#allocation4], 1 }

// kernel: tpu_custom_call.1
= control target key start
LH: loop header
LB: loop body
LE: loop exit
PB: predicated region body
PF: predicated region fallthrough
CT: control target
= control target key end

     0   :  { %12 = vsyncpa [#allocation3], 0  ;;  %s793_s0 = inlined_call_operand.hbm [shape: f32[8,128], index: 0, kind: input, shape index: {}]   ;;  %s794_s1 = inlined_call_operand.hbm [shape: f32[128,128], index: 1, kind: input, shape index: {}]   ;;  %s795_s2 = inlined_call_operand.vmem [shape: f32[1,128], index: 2, kind: input, shape index: {}]   ;;  %s796_s3 = inlined_call_operand.hbm [shape: f32[128,128], index: 3, kind: input, shape index: {}]   ;;  %s797_s4 = inlined_call_operand.vmem [shape: f32[1,128], index: 4, kind: input, shape index: {}]   ;;  %s798_s5 = inlined_call_operand.hbm [shape: f32[128,128], index: 5, kind: input, shape index: {}]   ;;  %s799_s6 = inlined_call_operand.vmem [shape: f32[1,128], index: 6, kind: input, shape index: {}]   ;;  %s800_s7 = inlined_call_operand.hbm [shape: f32[8,128], index: 7, kind: output, shape index: {}]  }
   0x1   :  { %13 = vsyncpa [#allocation6], 0 }
   0x2   :  { %14 = vsyncpa [#allocation9], 0 }
   0x3   :  { %15 = vsyncpa [#allocation4], 0  ;;  %s657_s24 = smov [#allocation5]  }
   0x4   :  { %s31_s25 = sshll.u32 %s657_s24, 4  ;;  %s32_s25 = int_to_ptr.vmem [resolvable:$true] %s31_s25 }
   0x5   :  { %s557_s26 = scalar_lea.vmem %s32_s25, 2048  ;;  %p562_p1 = scmp.lt.s32.totalorder %s32_s25, %s32_s25 }
   0x6   :  { %p558_p0 = scmp.ne.s32.totalorder %s32_s25, %s557_s26  ;;  %p563_p2 = scmp.lt.s32.totalorder %s557_s26, %s557_s26 }
   0x8   :  { %p564_p3 = por %p563_p2, %p562_p1 }
   0xa   :  { %p565_p4 = pnand %p564_p3, %p558_p0 }
   0xc   :  { %568 = shalt.err (!%p565_p4)
}
   0xd   :  { %s658_s27 = smov 128   ;;  %s659_s28 = smov 8  }
   0xe   :  { %37 = dma.hbm_to_vmem [thread:$0]  %s794_s1, 2048, %s32_s25, [#allocation6], %s658_s27, %s658_s27, %s659_s28  }
   0xf   :  { %s660_s8 = smov [#allocation2]   ;;  %s661_s10 = smov [#allocation7]  }
  0x10   :  { %s22_s9 = sshll.u32 %s660_s8, 4  ;;  %s45_s11 = sshll.u32 %s661_s10, 4  ;;  %s23_s9 = int_to_ptr.vmem [resolvable:$true] %s22_s9  ;;  %s46_s11 = int_to_ptr.vmem [resolvable:$true] %s45_s11 }
  0x11   :  { %s577_s12 = scalar_lea.vmem %s23_s9, 128  ;;  %p582_p6 = scmp.lt.s32.totalorder %s23_s9, %s23_s9 }
  0x12   :  { %p578_p5 = scmp.ne.s32.totalorder %s23_s9, %s577_s12  ;;  %p583_p7 = scmp.lt.s32.totalorder %s577_s12, %s577_s12 }
  0x14   :  { %p584_p8 = por %p583_p7, %p582_p6 }
  0x16   :  { %p585_p9 = pnand %p584_p8, %p578_p5 }
  0x18   :  { %588 = shalt.err (!%p585_p9)
}
  0x19   :  { %25 = dma.hbm_to_vmem [thread:$0]  %s793_s0, 128, %s23_s9, [#allocation3]  }
  0x1a   :  { %s597_s15 = scalar_lea.vmem %s46_s11, 2048  ;;  %p602_p11 = scmp.lt.s32.totalorder %s46_s11, %s46_s11 }
  0x1b   :  { %p598_p10 = scmp.ne.s32.totalorder %s46_s11, %s597_s15  ;;  %p603_p12 = scmp.lt.s32.totalorder %s597_s15, %s597_s15 }
  0x1d   :  { %p604_p13 = por %p603_p12, %p602_p11 }
  0x1f   :  { %p605_p0 = pnand %p604_p13, %p598_p10 }
  0x21   :  { %608 = shalt.err (!%p605_p0)
}
  0x22   :  { %51 = dma.hbm_to_vmem [thread:$0]  %s796_s3, 2048, %s46_s11, [#allocation6], %s658_s27, %s658_s27, %s659_s28  }
  0x23   :  { %s662_s17 = smov [#allocation8]  }
  0x24   :  { %s59_s18 = sshll.u32 %s662_s17, 4  ;;  %s60_s18 = int_to_ptr.vmem [resolvable:$true] %s59_s18 }
  0x25   :  { %s617_s19 = scalar_lea.vmem %s60_s18, 2048  ;;  %p622_p2 = scmp.lt.s32.totalorder %s60_s18, %s60_s18 }
  0x26   :  { %p618_p1 = scmp.ne.s32.totalorder %s60_s18, %s617_s19  ;;  %p623_p3 = scmp.lt.s32.totalorder %s617_s19, %s617_s19 }
  0x28   :  { %p624_p4 = por %p623_p3, %p622_p2 }
  0x2a   :  { %p625_p5 = pnand %p624_p4, %p618_p1 }
  0x2c   :  { %628 = shalt.err (!%p625_p5)
}
  0x2d   :  { %65 = dma.hbm_to_vmem [thread:$0]  %s798_s5, 2048, %s60_s18, [#allocation9], %s658_s27, %s658_s27, %s659_s28  }
  0x2e   :  { %649 = dma.done.wait [#allocation3], 128  }
  0x2f   :  { %650 = vsyncadd [#allocation3], 4294967168 }
  0x30   :  { %651 = dma.done.wait [#allocation6], 4096  }
  0x31   :  { %652 = vsyncadd [#allocation6], 4294963200 }
  0x32   :  { %653 = dma.done.wait [#allocation9], 2048  }
  0x33   :  { %654 = vsyncadd [#allocation9], 4294965248  ;;  %v663_v0 = vmov 0.0   ;;  %vm664_vm0 = vmmov 0   ;;  %v96_v1 = vld [vmem:[#allocation5 + $0x78] sm:$0xff]  ;;  %v95_v2 = vld [vmem:[#allocation5 + $0x70] sm:$0xff] }
  0x34   :  { %435 = vmatprep.subr.mxu0 %v663_v0  ;;  %467 = vmatprep.mubr.msk.f32.mxu0 %vm664_vm0, %v663_v0  ;;  %v94_v3 = vld [vmem:[#allocation5 + $0x68] sm:$0xff]  ;;  %v93_v4 = vld [vmem:[#allocation5 + $0x60] sm:$0xff]  ;;  %v190_v5 = vld [vmem:[#allocation7 + $0x78] sm:$0xff]  ;;  %s665_s24 = smov [#allocation10]  }
  0x35   :  { %470 = vmatprep.subr.mxu1 %v663_v0  ;;  %502 = vmatprep.mubr.msk.f32.mxu1 %vm664_vm0, %v663_v0  ;;  %v92_v6 = vld [vmem:[#allocation5 + $0x58] sm:$0xff]  ;;  %v189_v7 = vld [vmem:[#allocation7 + $0x70] sm:$0xff]  ;;  %v188_v8 = vld [vmem:[#allocation7 + $0x68] sm:$0xff]  ;;  %s370_s25 = sshll.u32 %s665_s24, 4  ;;  %s371_s25 = int_to_ptr.vmem [resolvable:$true] %s370_s25 }
  0x36   :  { %436 = vmatpush3.msra.mxu0 %v96_v1  ;;  %471 = vmatpush3.msra.mxu1 %v190_v5  ;;  %v91_v9 = vld [vmem:[#allocation5 + $0x50] sm:$0xff]  ;;  %v187_v10 = vld [vmem:[#allocation7 + $0x60] sm:$0xff]  ;;  %v90_v11 = vld [vmem:[#allocation5 + $0x48] sm:$0xff]  ;;  %s629_s26 = scalar_lea.vmem %s371_s25, 128  ;;  %p634_p7 = scmp.lt.s32.totalorder %s371_s25, %s371_s25 }
  0x37   :  { %437 = vmatprep.subr.mxu0 %v663_v0  ;;  %472 = vmatprep.subr.mxu1 %v663_v0  ;;  %v186_v12 = vld [vmem:[#allocation7 + $0x58] sm:$0xff]  ;;  %v89_v13 = vld [vmem:[#allocation5 + $0x40] sm:$0xff]  ;;  %v185_v14 = vld [vmem:[#allocation7 + $0x50] sm:$0xff]  ;;  %p630_p6 = scmp.ne.s32.totalorder %s371_s25, %s629_s26  ;;  %p635_p8 = scmp.lt.s32.totalorder %s629_s26, %s629_s26 }
  0x38   :  { %438 = vmatpush3.msra.mxu0 %v95_v2  ;;  %473 = vmatpush3.msra.mxu1 %v189_v7  ;;  %v88_v15 = vld [vmem:[#allocation5 + $0x38] sm:$0xff]  ;;  %v184_v16 = vld [vmem:[#allocation7 + $0x48] sm:$0xff]  ;;  %v87_v17 = vld [vmem:[#allocation5 + $0x30] sm:$0xff] }
  0x39   :  { %439 = vmatprep.subr.mxu0 %v663_v0  ;;  %474 = vmatprep.subr.mxu1 %v663_v0  ;;  %v183_v18 = vld [vmem:[#allocation7 + $0x40] sm:$0xff]  ;;  %v86_v19 = vld [vmem:[#allocation5 + $0x28] sm:$0xff]  ;;  %v182_v20 = vld [vmem:[#allocation7 + $0x38] sm:$0xff]  ;;  %p636_p9 = por %p635_p8, %p634_p7 }
  0x3a   :  { %440 = vmatpush3.msra.mxu0 %v94_v3  ;;  %475 = vmatpush3.msra.mxu1 %v188_v8  ;;  %v85_v21 = vld [vmem:[#allocation5 + $0x20] sm:$0xff]  ;;  %v181_v22 = vld [vmem:[#allocation7 + $0x30] sm:$0xff]  ;;  %v84_v23 = vld [vmem:[#allocation5 + $0x18] sm:$0xff] }
  0x3b   :  { %441 = vmatprep.subr.mxu0 %v663_v0  ;;  %476 = vmatprep.subr.mxu1 %v663_v0  ;;  %v180_v24 = vld [vmem:[#allocation7 + $0x28] sm:$0xff]  ;;  %v83_v25 = vld [vmem:[#allocation5 + $0x10] sm:$0xff]  ;;  %v179_v26 = vld [vmem:[#allocation7 + $0x20] sm:$0xff]  ;;  %p637_p10 = pnand %p636_p9, %p630_p6 }
  0x3c   :  { %442 = vmatpush3.msra.mxu0 %v93_v4  ;;  %477 = vmatpush3.msra.mxu1 %v187_v10  ;;  %v82_v27 = vld [vmem:[#allocation5 + $0x8] sm:$0xff]  ;;  %v178_v28 = vld [vmem:[#allocation7 + $0x18] sm:$0xff]  ;;  %v81_v29 = vld [vmem:[#allocation5] sm:$0xff] }
  0x3d   :  { %443 = vmatprep.subr.mxu0 %v663_v0  ;;  %478 = vmatprep.subr.mxu1 %v663_v0  ;;  %v80_v30 = vld [vmem:[#allocation2] sm:$0xff]  ;;  %v177_v31 = vld [vmem:[#allocation7 + $0x10] sm:$0xff]  ;;  %v176_v32 = vld [vmem:[#allocation7 + $0x8] sm:$0xff] }
  0x3e   :  { %444 = vmatpush3.msra.mxu0 %v92_v6  ;;  %479 = vmatpush3.msra.mxu1 %v186_v12  ;;  %v175_v33 = vld [vmem:[#allocation7] sm:$0xff]  ;;  %v284_v34 = vld [vmem:[#allocation8 + $0x78] sm:$0xff]  ;;  %v283_v35 = vld [vmem:[#allocation8 + $0x70] sm:$0xff] }
  0x3f   :  { %445 = vmatprep.subr.mxu0 %v663_v0  ;;  %480 = vmatprep.subr.mxu1 %v663_v0  ;;  %v282_v36 = vld [vmem:[#allocation8 + $0x68] sm:$0xff]  ;;  %v281_v37 = vld [vmem:[#allocation8 + $0x60] sm:$0xff]  ;;  %v280_v38 = vld [vmem:[#allocation8 + $0x58] sm:$0xff] }
  0x40   :  { %446 = vmatpush3.msra.mxu0 %v91_v9  ;;  %481 = vmatpush3.msra.mxu1 %v185_v14  ;;  %v279_v39 = vld [vmem:[#allocation8 + $0x50] sm:$0xff]  ;;  %v278_v40 = vld [vmem:[#allocation8 + $0x48] sm:$0xff]  ;;  %v277_v41 = vld [vmem:[#allocation8 + $0x40] sm:$0xff] }
  0x41   :  { %447 = vmatprep.subr.mxu0 %v663_v0  ;;  %482 = vmatprep.subr.mxu1 %v663_v0  ;;  %v276_v42 = vld [vmem:[#allocation8 + $0x38] sm:$0xff]  ;;  %v275_v43 = vld [vmem:[#allocation8 + $0x30] sm:$0xff]  ;;  %v274_v44 = vld [vmem:[#allocation8 + $0x28] sm:$0xff] }
  0x42   :  { %448 = vmatpush3.msra.mxu0 %v90_v11  ;;  %483 = vmatpush3.msra.mxu1 %v184_v16  ;;  %v273_v45 = vld [vmem:[#allocation8 + $0x20] sm:$0xff]  ;;  %v272_v46 = vld [vmem:[#allocation8 + $0x18] sm:$0xff]  ;;  %v271_v52 = vld [vmem:[#allocation8 + $0x10] sm:$0xff] }
  0x43   :  { %449 = vmatprep.subr.mxu0 %v663_v0  ;;  %484 = vmatprep.subr.mxu1 %v663_v0  ;;  %v381_v47 = vld [vmem:[%s795_s2] ss:$0 sm:$0xff]  ;;  %v270_v53 = vld [vmem:[#allocation8 + $0x8] sm:$0xff]  ;;  %v269_v54 = vld [vmem:[#allocation8] sm:$0xff] }
  0x44   :  { %450 = vmatpush3.msra.mxu0 %v89_v13  ;;  %485 = vmatpush3.msra.mxu1 %v183_v18  ;;  %v382_v55 = vld [vmem:[%s797_s4] ss:$0 sm:$0xff] }
  0x45   :  { %451 = vmatprep.subr.mxu0 %v663_v0  ;;  %486 = vmatprep.subr.mxu1 %v663_v0  ;;  %v383_v60 = vld [vmem:[%s799_s6] ss:$0 sm:$0xff] }
  0x46   :  { %452 = vmatpush3.msra.mxu0 %v88_v15  ;;  %487 = vmatpush3.msra.mxu1 %v182_v20 }
  0x47   :  { %453 = vmatprep.subr.mxu0 %v663_v0  ;;  %488 = vmatprep.subr.mxu1 %v663_v0 }
  0x48   :  { %454 = vmatpush3.msra.mxu0 %v87_v17  ;;  %489 = vmatpush3.msra.mxu1 %v181_v22 }
  0x49   :  { %455 = vmatprep.subr.mxu0 %v663_v0  ;;  %490 = vmatprep.subr.mxu1 %v663_v0 }
  0x4a   :  { %456 = vmatpush3.msra.mxu0 %v86_v19  ;;  %491 = vmatpush3.msra.mxu1 %v180_v24 }
  0x4b   :  { %457 = vmatprep.subr.mxu0 %v663_v0  ;;  %492 = vmatprep.subr.mxu1 %v663_v0 }
  0x4c   :  { %458 = vmatpush3.msra.mxu0 %v85_v21  ;;  %493 = vmatpush3.msra.mxu1 %v179_v26 }
  0x4d   :  { %459 = vmatprep.subr.mxu0 %v663_v0  ;;  %494 = vmatprep.subr.mxu1 %v663_v0 }
  0x4e   :  { %460 = vmatpush3.msra.mxu0 %v84_v23  ;;  %495 = vmatpush3.msra.mxu1 %v178_v28 }
  0x4f   :  { %461 = vmatprep.subr.mxu0 %v663_v0  ;;  %496 = vmatprep.subr.mxu1 %v663_v0 }
  0x50   :  { %462 = vmatpush3.msra.mxu0 %v83_v25  ;;  %497 = vmatpush3.msra.mxu1 %v177_v31 }
  0x51   :  { %463 = vmatprep.subr.mxu0 %v663_v0  ;;  %498 = vmatprep.subr.mxu1 %v663_v0 }
  0x52   :  { %464 = vmatpush3.msra.mxu0 %v82_v27  ;;  %499 = vmatpush3.msra.mxu1 %v176_v32 }
  0x53   :  { %465 = vmatprep.subr.mxu0 %v663_v0  ;;  %500 = vmatprep.subr.mxu1 %v663_v0 }
  0x54   :  { %466 = vmatpush3.msra.mxu0 %v81_v29  ;;  %501 = vmatpush3.msra.mxu1 %v175_v33 }
  0x55   :  { %468 = vmatmul.mubr.f32.vlgmr.msra.gmra.mxu0 %v80_v30  ;;  %505 = vmatprep.subr.mxu0 %v663_v0 }
  0x56   :  { %537 = vmatprep.mubr.msk.f32.mxu0 %vm664_vm0, %v663_v0  ;;  %506 = vmatpush3.msra.mxu0 %v284_v34 }
  0x57   :  { %507 = vmatprep.subr.mxu0 %v663_v0 }
  0x58   :  { %508 = vmatpush3.msra.mxu0 %v283_v35 }
  0x59   :  { %509 = vmatprep.subr.mxu0 %v663_v0 }
  0x5a   :  { %510 = vmatpush3.msra.mxu0 %v282_v36 }
  0x5b   :  { %511 = vmatprep.subr.mxu0 %v663_v0 }
  0x5c   :  { %512 = vmatpush3.msra.mxu0 %v281_v37 }
  0x5d   :  { %513 = vmatprep.subr.mxu0 %v663_v0 }
  0x5e   :  { %514 = vmatpush3.msra.mxu0 %v280_v38 }
  0x5f   :  { %515 = vmatprep.subr.mxu0 %v663_v0 }
  0x60   :  { %516 = vmatpush3.msra.mxu0 %v279_v39 }
  0x61   :  { %517 = vmatprep.subr.mxu0 %v663_v0 }
  0x62   :  { %518 = vmatpush3.msra.mxu0 %v278_v40 }
  0x63   :  { %519 = vmatprep.subr.mxu0 %v663_v0 }
  0x64   :  { %520 = vmatpush3.msra.mxu0 %v277_v41 }
  0x65   :  { %521 = vmatprep.subr.mxu0 %v663_v0 }
  0x66   :  { %522 = vmatpush3.msra.mxu0 %v276_v42 }
  0x67   :  { %523 = vmatprep.subr.mxu0 %v663_v0 }
  0x68   :  { %524 = vmatpush3.msra.mxu0 %v275_v43 }
  0x69   :  { %525 = vmatprep.subr.mxu0 %v663_v0 }
  0x6a   :  { %526 = vmatpush3.msra.mxu0 %v274_v44 }
  0x6b   :  { %527 = vmatprep.subr.mxu0 %v663_v0 }
  0x6c   :  { %528 = vmatpush3.msra.mxu0 %v273_v45 }
  0x6d   :  { %529 = vmatprep.subr.mxu0 %v663_v0 }
  0x6e   :  { %530 = vmatpush3.msra.mxu0 %v272_v46 }
  0x6f   :  { %531 = vmatprep.subr.mxu0 %v663_v0 }
  0x70   :  { %532 = vmatpush3.msra.mxu0 %v271_v52 }
  0x71   :  { %533 = vmatprep.subr.mxu0 %v663_v0 }
  0x72   :  { %534 = vmatpush3.msra.mxu0 %v270_v53 }
  0x73   :  { %535 = vmatprep.subr.mxu0 %v663_v0 }
  0x74   :  { %536 = vmatpush3.msra.mxu0 %v269_v54 }
 0x115   :  { %v170_v48 = vpop.f32.mrf.mxu0 }
 0x116   :  { %v171_v49 = vadd.f32 %v381_v47, %v170_v48 }
 0x117   :  { %v469_v50 = vpop.f32.mrf.mxu0 }
 0x118   :  { %v174_v51 = vmax.f32 %v171_v49, 0.0 }
 0x11a   :  { %503 = vmatmul.mubr.f32.vlgmr.msra.gmra.mxu1 %v174_v51 }
 0x1da   :  { %v264_v56 = vpop.f32.mrf.mxu1 }
 0x1db   :  { %v265_v57 = vadd.f32 %v382_v55, %v264_v56 }
 0x1dc   :  { %v504_v58 = vpop.f32.mrf.mxu1 }
 0x1dd   :  { %v268_v59 = vmax.f32 %v265_v57, 0.0 }
 0x1df   :  { %538 = vmatmul.mubr.f32.vlgmr.msra.gmra.mxu0 %v268_v59 }
 0x29f   :  { %v358_v61 = vpop.f32.mrf.mxu0 }
 0x2a0   :  { %v359_v62 = vadd.f32 %v383_v60, %v358_v61 }
 0x2a1   :  { %v539_v63 = vpop.f32.mrf.mxu0 }
 0x2a2   :  { %v362_v0 = vmax.f32 %v359_v62, 0.0 }
 0x2a4   :  { %363 = vst [vmem:[#allocation10] sm:$0xff] %v362_v0 }
 0x2a5   :  { %640 = shalt.err (!%p637_p10)
}
 0x2a6   :  { %373 = dma.vmem_to_hbm [thread:$0]  %s371_s25, 128, %s800_s7, [#allocation4]  }
 0x2a7   :  { %655 = dma.done.wait [#allocation4], 128  }
 0x2a8   :  { %656 = vsyncadd [#allocation4], 4294967168 }
 0x2a9   :  { %377 = vsyncpa [#allocation3], 1 }
 0x2aa   :  { %378 = vsyncpa [#allocation6], 1 }
 0x2ab   :  { %379 = vsyncpa [#allocation9], 1 }
 0x2ac   :  { %380 = vsyncpa [#allocation4], 1 }

</bundles_post_ra>
